<compile_context>
chip_gen: v7x
topology: tpu7x:2x2x1
jax: 0.10.0
libtpu: 0.0.40
codegen_flags: <defaults>
</compile_context>

<pallas_src>
import jax
import jax.numpy as jnp
from jax.experimental import pallas as pl
from jax.experimental.pallas import tpu as pltpu


def _round_up(x, m):
    return (x + m - 1) // m * m


# ---------------------------------------------------------------------------
# Shared math helpers — used by both kernels AND the pure-JAX reference so the
# precision policy is identical on both sides.
# ---------------------------------------------------------------------------
def _feature_embed(anime_features, params):
    """anime_feature_embed Linear (K = num_anime_features, tiny), f32 math."""
    fe = jnp.dot(anime_features.astype(jnp.float32), params["wfe"],
                 preferred_element_type=jnp.float32) + params["bfe"]
    return fe.astype(jnp.bfloat16)


def _mlp_tail(h1, w2, b2, w3, b3, w4, b4):
    """MLP layers 2..4 on the pre-activation first-layer output h1 (f32):
    bf16 operands, f32 MXU accumulation, f32 biases."""
    f32, bf16 = jnp.float32, jnp.bfloat16
    h = jnp.maximum(h1, 0.0)
    h = jnp.maximum(jnp.dot(h.astype(bf16), w2, preferred_element_type=f32) + b2, 0.0)
    h = jnp.maximum(jnp.dot(h.astype(bf16), w3, preferred_element_type=f32) + b3, 0.0)
    return jnp.dot(h.astype(bf16), w4, preferred_element_type=f32) + b4


def _weighted_rowsum(w_row, x):
    """(1, E) final-layer weight row applied to (B, E) activations and reduced
    over E with the batch landing on lanes: one MXU A.B^T op producing a
    lane-dense (1, B) row (attention-score dot_general pattern)."""
    return jax.lax.dot_general(
        w_row.astype(jnp.bfloat16), x.astype(jnp.bfloat16),
        dimension_numbers=(((1,), (1,)), ((), ())),
        preferred_element_type=jnp.float32)


# ---------------------------------------------------------------------------
# Kernel A: embedding tables VMEM-resident, in-kernel one-hot gather.
# ---------------------------------------------------------------------------
def _ncf_resident_kernel(
    idx_ref,      # (TB, 2)   int32  [:,0]=user idx, [:,1]=item idx
    fe_ref,       # (TB, Hh)  bf16   anime_feature_embed output (from wrapper)
    umf_t_ref,    # (NUp, Ep) bf16   user MF table   (VMEM-resident)
    imf_t_ref,    # (NIp, Ep) bf16   item MF table
    umlp_t_ref,   # (NUp, Hh) bf16   user MLP table
    imlp_t_ref,   # (NIp, Hh) bf16   item MLP table
    w1u_ref, w1i_ref, w1f_ref,       # (Hh, H0) bf16  first Linear, row blocks
    b1_ref,                          # (1, H0)  f32
    w2_ref, b2_ref, w3_ref, b3_ref,  # bf16 / f32
    w4_ref, b4_ref,                  # (H2, Ep) bf16 / (1, Ep) f32
    wfmf_ref, wfmlp_ref,             # (1, Ep)  f32   final Linear row slices
    bf_ref,                          # (1, 1)   f32
    out_ref,                         # (1, TB)  f32   lane-dense output row
):
    f32, bf16 = jnp.float32, jnp.bfloat16
    tb = idx_ref.shape[0]
    nu = umf_t_ref.shape[0]
    ni = imf_t_ref.shape[0]

    # In-kernel gather: one-hot built on the VPU, row selection as an exact
    # bf16 one-hot @ table MXU matmul (tables never leave VMEM; no HBM
    # round-trip for gathered rows).
    u_idx = idx_ref[:, 0:1]
    u_oh = jnp.where(
        jax.lax.broadcasted_iota(jnp.int32, (tb, nu), 1) == u_idx,
        1.0, 0.0).astype(bf16)
    umf = jnp.dot(u_oh, umf_t_ref[...], preferred_element_type=f32)
    umlp = jnp.dot(u_oh, umlp_t_ref[...], preferred_element_type=f32).astype(bf16)

    i_idx = idx_ref[:, 1:2]
    i_oh = jnp.where(
        jax.lax.broadcasted_iota(jnp.int32, (tb, ni), 1) == i_idx,
        1.0, 0.0).astype(bf16)
    imf = jnp.dot(i_oh, imf_t_ref[...], preferred_element_type=f32)
    imlp = jnp.dot(i_oh, imlp_t_ref[...], preferred_element_type=f32).astype(bf16)

    # GMF branch: reduce to its (1, TB) contribution immediately so the
    # (TB, Ep) product dies before the MLP tower runs (live-range collapse).
    mf_row = _weighted_rowsum(wfmf_ref[...], umf * imf)

    # MLP tower.  torch.cat([u_mlp, i_mlp, feat_emb]) @ W1 == sum of row-block
    # matmuls, so no in-kernel concat is needed.
    h1 = (jnp.dot(umlp, w1u_ref[...], preferred_element_type=f32)
          + jnp.dot(imlp, w1i_ref[...], preferred_element_type=f32)
          + jnp.dot(fe_ref[...], w1f_ref[...], preferred_element_type=f32)
          + b1_ref[...])
    # TODO(synk): nn.Dropout(0.1) layers are identity (eval-mode semantics).
    mlp_vec = _mlp_tail(h1, w2_ref[...], b2_ref[...], w3_ref[...], b3_ref[...],
                        w4_ref[...], b4_ref[...])
    mlp_row = _weighted_rowsum(wfmlp_ref[...], mlp_vec)

    out_ref[...] = (mf_row + mlp_row + bf_ref[...]).astype(out_ref.dtype)


# ---------------------------------------------------------------------------
# Kernel B: fallback for tables too large for VMEM — rows pre-gathered by XLA.
# ---------------------------------------------------------------------------
def _ncf_pregathered_kernel(
    umf_ref,      # (TB, Ep)   bf16
    imf_ref,      # (TB, Ep)   bf16
    mlpin_ref,    # (TB, 3*Hh) bf16  [user_MLP | item_MLP | feat_embed]
    w1_ref, b1_ref, w2_ref, b2_ref, w3_ref, b3_ref, w4_ref, b4_ref,
    wfmf_ref, wfmlp_ref, bf_ref,
    out_ref,      # (1, TB) f32
):
    f32 = jnp.float32
    mf_row = _weighted_rowsum(
        wfmf_ref[...], umf_ref[...].astype(f32) * imf_ref[...].astype(f32))
    h1 = (jnp.dot(mlpin_ref[...], w1_ref[...], preferred_element_type=f32)
          + b1_ref[...])
    # TODO(synk): nn.Dropout(0.1) layers are identity (eval-mode semantics).
    mlp_vec = _mlp_tail(h1, w2_ref[...], b2_ref[...], w3_ref[...], b3_ref[...],
                        w4_ref[...], b4_ref[...])
    mlp_row = _weighted_rowsum(wfmlp_ref[...], mlp_vec)
    out_ref[...] = (mf_row + mlp_row + bf_ref[...]).astype(out_ref.dtype)


# ---------------------------------------------------------------------------
# Wrapper.
# ---------------------------------------------------------------------------
def _pick_batch_tile(batch, max_tile=2048):
    """Largest tile in [128, max_tile] (multiple of 128) that keeps >= 2 grid
    steps (both v7x TensorCores busy); tiny batches use one 8-aligned tile."""
    if batch <= 256:
        return _round_up(max(batch, 8), 8)
    for cand in (2048, 1024, 512, 256, 128):
        if cand <= max_tile and batch >= 2 * cand:
            return cand
    return 128


def ncf_forward(user_indices, item_indices, anime_features, params,
                use_resident_tables=None):
    """NCF forward pass.  Returns shape (B,) float32 scores."""
    B = user_indices.shape[0]
    Hh = params["user_embed_MLP"].shape[1]

    # Feature-embed Linear folded into the wrapper (K = num_anime_features is
    # tiny); only its bf16 output rides with the batch stream — removes the
    # narrow (TB, 2) f32 kernel input and its strided DMA.
    fe = _feature_embed(anime_features, params)                      # (B, Hh) bf16

    tables = ("user_embed_MF", "item_embed_MF",
              "user_embed_MLP", "item_embed_MLP")
    table_bytes = sum(params[t].size * params[t].dtype.itemsize for t in tables)
    max_rows = max(params["user_embed_MF"].shape[0],
                   params["item_embed_MF"].shape[0])
    if use_resident_tables is None:
        # TODO(synk): million-row catalogs cannot live in VMEM; they take the
        # pre-gathered fallback path (XLA gather feeding kernel B).
        use_resident_tables = (table_bytes <= 4 * 1024 * 1024
                               and max_rows <= 1024)

    # Bound the (TB, rows) one-hot temporaries when tables have many rows.
    max_tb = 1024 if (use_resident_tables and max_rows > 256) else 2048
    TB = _pick_batch_tile(B, max_tb)
    B_pad = _round_up(B, TB)
    n_tiles = B_pad // TB

    def pad_rows(x):
        if B_pad == B:
            return x
        return jnp.pad(x, ((0, B_pad - B), (0, 0)))

    if use_resident_tables:
        idx = jnp.stack([user_indices.astype(jnp.int32),
                         item_indices.astype(jnp.int32)], axis=-1)   # (B, 2)
        batch_inputs = [pad_rows(idx), pad_rows(fe)]
        w1 = params["w1"]
        weight_inputs = [
            params["user_embed_MF"], params["item_embed_MF"],
            params["user_embed_MLP"], params["item_embed_MLP"],
            w1[:Hh], w1[Hh:2 * Hh], w1[2 * Hh:], params["b1"],
            params["w2"], params["b2"], params["w3"], params["b3"],
            params["w4"], params["b4"],
            params["wf_mf"], params["wf_mlp"], params["bf"],
        ]
        kernel = _ncf_resident_kernel
    else:
        umf = params["user_embed_MF"][user_indices]
        imf = params["item_embed_MF"][item_indices]
        mlp_in = jnp.concatenate(
            [params["user_embed_MLP"][user_indices],
             params["item_embed_MLP"][item_indices], fe], axis=-1)   # (B, 3*Hh)
        batch_inputs = [pad_rows(umf), pad_rows(imf), pad_rows(mlp_in)]
        weight_inputs = [
            params["w1"], params["b1"], params["w2"], params["b2"],
            params["w3"], params["b3"], params["w4"], params["b4"],
            params["wf_mf"], params["wf_mlp"], params["bf"],
        ]
        kernel = _ncf_pregathered_kernel

    def tiled(x):       # new batch block every grid step (pipelined DMAs)
        return pl.BlockSpec((TB, x.shape[1]), lambda i: (i, 0))

    def resident(x):    # full array, same block every step -> stays in VMEM
        return pl.BlockSpec(x.shape, lambda i: (0, 0))

    out = pl.pallas_call(
        kernel,
        out_shape=jax.ShapeDtypeStruct((1, B_pad), jnp.float32),
        grid=(n_tiles,),
        in_specs=[tiled(x) for x in batch_inputs]
                 + [resident(w) for w in weight_inputs],
        # Lane-dense output: one contiguous (1, TB) row per grid step.
        out_specs=pl.BlockSpec((1, TB), lambda i: (0, i)),
        compiler_params=pltpu.CompilerParams(
            dimension_semantics=("parallel",),        # megacore sharding on v7x
            vmem_limit_bytes=32 * 1024 * 1024,
        ),
    )(*batch_inputs, *weight_inputs)
    return out.reshape(B_pad)[:B]


# ---------------------------------------------------------------------------
# Deterministic parameter construction (synthetic; no checkpoint loading).
# emb_dim is zero-padded to a multiple of 128 (lane-dense); table row counts
# are zero-padded to a multiple of 128 (resident-gather K dim).  All padding
# is exactly zero, so the math is exactly the 100-dim model.
# ---------------------------------------------------------------------------
def make_params(key, num_users, num_items, num_anime_features,
                emb_dim=100, hidden_layers=(64, 32, 16)):
    f32, bf16 = jnp.float32, jnp.bfloat16
    h_half = hidden_layers[0] // 2
    e_pad = _round_up(emb_dim, 128)
    nu_pad = _round_up(num_users, 128)
    ni_pad = _round_up(num_items, 128)
    keys = jax.random.split(key, 10)
    k = iter(keys)

    def pad_to(x, rows, cols):
        return jnp.pad(x, ((0, rows - x.shape[0]), (0, cols - x.shape[1])))

    def lin(kk, fan_in, fan_out):
        bound = float(fan_in) ** -0.5
        kw, kb = jax.random.split(kk)
        w = jax.random.uniform(kw, (fan_in, fan_out), f32, -bound, bound)
        b = jax.random.uniform(kb, (1, fan_out), f32, -bound, bound)
        return w, b

    p = {}
    p["user_embed_MF"] = pad_to(
        jax.random.normal(next(k), (num_users, emb_dim), f32), nu_pad, e_pad
    ).astype(bf16)
    p["item_embed_MF"] = pad_to(
        jax.random.normal(next(k), (num_items, emb_dim), f32), ni_pad, e_pad
    ).astype(bf16)
    p["user_embed_MLP"] = pad_to(
        jax.random.normal(next(k), (num_users, h_half), f32), nu_pad, h_half
    ).astype(bf16)
    p["item_embed_MLP"] = pad_to(
        jax.random.normal(next(k), (num_items, h_half), f32), ni_pad, h_half
    ).astype(bf16)

    # anime_feature_embed Linear (kept f32; applied in the XLA wrapper).
    p["wfe"], p["bfe"] = lin(next(k), num_anime_features, h_half)

    # MLP tower Linears (bf16 weights, f32 biases).
    w1, p["b1"] = lin(next(k), h_half * 3, hidden_layers[0])
    p["w1"] = w1.astype(bf16)
    w2, p["b2"] = lin(next(k), hidden_layers[0], hidden_layers[1])
    p["w2"] = w2.astype(bf16)
    w3, p["b3"] = lin(next(k), hidden_layers[1], hidden_layers[2])
    p["w3"] = w3.astype(bf16)
    w4, b4 = lin(next(k), hidden_layers[2], emb_dim)
    p["w4"] = jnp.pad(w4, ((0, 0), (0, e_pad - emb_dim))).astype(bf16)
    p["b4"] = jnp.pad(b4, ((0, 0), (0, e_pad - emb_dim)))

    # Final Linear: in = 2*emb_dim; split rows into mf / mlp slices and store
    # as f32 (1, e_pad) rows (tiny, kept f32 per review).
    wf, p["bf"] = lin(next(k), emb_dim * 2, 1)
    p["wf_mf"] = jnp.pad(wf[:emb_dim].T, ((0, 0), (0, e_pad - emb_dim)))
    p["wf_mlp"] = jnp.pad(wf[emb_dim:].T, ((0, 0), (0, e_pad - emb_dim)))
    return p


# ---------------------------------------------------------------------------
# Pure-JAX reference (same math & precision policy, no Pallas).
# ---------------------------------------------------------------------------
def ncf_reference(user_indices, item_indices, anime_features, params):
    f32 = jnp.float32
    umf = params["user_embed_MF"][user_indices].astype(f32)
    imf = params["item_embed_MF"][item_indices].astype(f32)
    fe = _feature_embed(anime_features, params)
    mlp_in = jnp.concatenate(
        [params["user_embed_MLP"][user_indices],
         params["item_embed_MLP"][item_indices], fe], axis=-1)
    h1 = (jnp.dot(mlp_in, params["w1"], preferred_element_type=f32)
          + params["b1"])
    mlp_vec = _mlp_tail(h1, params["w2"], params["b2"], params["w3"],
                        params["b3"], params["w4"], params["b4"])
    mf_row = _weighted_rowsum(params["wf_mf"], umf * imf)
    mlp_row = _weighted_rowsum(params["wf_mlp"], mlp_vec)
    return (mf_row + mlp_row + params["bf"])[0]


if __name__ == "__main__":
    # Small synthetic sizes consistent with the module's forward.
    num_users = 50
    num_items = 60
    num_anime_features = 2
    emb_dim = 100
    hidden_layers = (64, 32, 16)

    key = jax.random.PRNGKey(0)
    kp, kdata = jax.random.split(key)
    params = make_params(kp, num_users, num_items, num_anime_features,
                         emb_dim, hidden_layers)

    fwd = jax.jit(ncf_forward, static_argnames=("use_resident_tables",))

    # batch=8 exercises the single-tile path; batch=333 exercises the tiled,
    # padded, multi-step ("parallel") grid.  Both kernel variants are checked.
    for batch in (8, 333):
        kb = jax.random.fold_in(kdata, batch)
        ku, ki, kf = jax.random.split(kb, 3)
        user_indices = jax.random.randint(ku, (batch,), 0, num_users,
                                          dtype=jnp.int32)
        item_indices = jax.random.randint(ki, (batch,), 0, num_items,
                                          dtype=jnp.int32)
        anime_features = jax.random.normal(kf, (batch, num_anime_features),
                                           jnp.float32)

        ref = ncf_reference(user_indices, item_indices, anime_features, params)
        for resident in (True, False):
            out = fwd(user_indices, item_indices, anime_features, params,
                      use_resident_tables=resident)
            out = jax.block_until_ready(out)
            assert out.shape == (batch,), (out.shape, batch)
            assert jnp.allclose(out, ref, atol=2e-3, rtol=2e-3), (
                resident, batch, out, ref)

    print("KERNEL_OK")
</pallas_src>

<mosaic_0001>
module attributes {stable_mosaic.version = 11 : i64} {
  func.func @_ncf_resident_kernel(%arg0: i32, %arg1: memref<8x2xi32, #tpu.memory_space<vmem>>, %arg2: memref<8x32xbf16, #tpu.memory_space<vmem>>, %arg3: memref<128x128xbf16, #tpu.memory_space<vmem>>, %arg4: memref<128x128xbf16, #tpu.memory_space<vmem>>, %arg5: memref<128x32xbf16, #tpu.memory_space<vmem>>, %arg6: memref<128x32xbf16, #tpu.memory_space<vmem>>, %arg7: memref<32x64xbf16, #tpu.memory_space<vmem>>, %arg8: memref<32x64xbf16, #tpu.memory_space<vmem>>, %arg9: memref<32x64xbf16, #tpu.memory_space<vmem>>, %arg10: memref<1x64xf32, #tpu.memory_space<vmem>>, %arg11: memref<64x32xbf16, #tpu.memory_space<vmem>>, %arg12: memref<1x32xf32, #tpu.memory_space<vmem>>, %arg13: memref<32x16xbf16, #tpu.memory_space<vmem>>, %arg14: memref<1x16xf32, #tpu.memory_space<vmem>>, %arg15: memref<16x128xbf16, #tpu.memory_space<vmem>>, %arg16: memref<1x128xf32, #tpu.memory_space<vmem>>, %arg17: memref<1x128xf32, #tpu.memory_space<vmem>>, %arg18: memref<1x128xf32, #tpu.memory_space<vmem>>, %arg19: memref<1x1xf32, #tpu.memory_space<vmem>>, %arg20: memref<1x8xf32, #tpu.memory_space<vmem>>) attributes {dimension_semantics = [#tpu.dimension_semantics<parallel>], iteration_bounds = array<i64: 1>, scalar_prefetch = 0 : i64, scratch_operands = 0 : i64, tpu.core_type = #tpu.core_type<tc>, window_params = [{transform_indices = @transform_0, window_bounds = array<i64: 8, 2>}, {transform_indices = @transform_1, window_bounds = array<i64: 8, 32>}, {pipeline_mode = #tpu.pipeline_mode<synchronous>, transform_indices = @transform_2, window_bounds = array<i64: 128, 128>}, {pipeline_mode = #tpu.pipeline_mode<synchronous>, transform_indices = @transform_3, window_bounds = array<i64: 128, 128>}, {pipeline_mode = #tpu.pipeline_mode<synchronous>, transform_indices = @transform_4, window_bounds = array<i64: 128, 32>}, {pipeline_mode = #tpu.pipeline_mode<synchronous>, transform_indices = @transform_5, window_bounds = array<i64: 128, 32>}, {pipeline_mode = #tpu.pipeline_mode<synchronous>, transform_indices = @transform_6, window_bounds = array<i64: 32, 64>}, {pipeline_mode = #tpu.pipeline_mode<synchronous>, transform_indices = @transform_7, window_bounds = array<i64: 32, 64>}, {pipeline_mode = #tpu.pipeline_mode<synchronous>, transform_indices = @transform_8, window_bounds = array<i64: 32, 64>}, {pipeline_mode = #tpu.pipeline_mode<synchronous>, transform_indices = @transform_9, window_bounds = array<i64: 1, 64>}, {pipeline_mode = #tpu.pipeline_mode<synchronous>, transform_indices = @transform_10, window_bounds = array<i64: 64, 32>}, {pipeline_mode = #tpu.pipeline_mode<synchronous>, transform_indices = @transform_11, window_bounds = array<i64: 1, 32>}, {pipeline_mode = #tpu.pipeline_mode<synchronous>, transform_indices = @transform_12, window_bounds = array<i64: 32, 16>}, {pipeline_mode = #tpu.pipeline_mode<synchronous>, transform_indices = @transform_13, window_bounds = array<i64: 1, 16>}, {pipeline_mode = #tpu.pipeline_mode<synchronous>, transform_indices = @transform_14, window_bounds = array<i64: 16, 128>}, {pipeline_mode = #tpu.pipeline_mode<synchronous>, transform_indices = @transform_15, window_bounds = array<i64: 1, 128>}, {pipeline_mode = #tpu.pipeline_mode<synchronous>, transform_indices = @transform_16, window_bounds = array<i64: 1, 128>}, {pipeline_mode = #tpu.pipeline_mode<synchronous>, transform_indices = @transform_17, window_bounds = array<i64: 1, 128>}, {pipeline_mode = #tpu.pipeline_mode<synchronous>, transform_indices = @transform_18, window_bounds = array<i64: 1, 1>}, {transform_indices = @transform_19, window_bounds = array<i64: 1, 8>}]} {
    %c0 = arith.constant 0 : index
    %c0_0 = arith.constant 0 : index
    %0 = vector.load %arg1[%c0, %c0_0] : memref<8x2xi32, #tpu.memory_space<vmem>>, vector<8x1xi32>
    %1 = tpu.iota {dimensions = array<i32: 1>} : vector<8x128xi32>
    %2 = vector.broadcast %0 : vector<8x1xi32> to vector<8x128xi32>
    %3 = arith.cmpi eq, %1, %2 : vector<8x128xi32>
    %cst = arith.constant 1.000000e+00 : f32
    %cst_1 = arith.constant 0.000000e+00 : f32
    %4 = vector.broadcast %cst : f32 to vector<8x128xf32>
    %5 = vector.broadcast %cst_1 : f32 to vector<8x128xf32>
    %6 = arith.select %3, %4, %5 : vector<8x128xi1>, vector<8x128xf32>
    %7 = arith.truncf %6 : vector<8x128xf32> to vector<8x128xbf16>
    %c0_2 = arith.constant 0 : index
    %c0_3 = arith.constant 0 : index
    %8 = vector.load %arg3[%c0_2, %c0_3] : memref<128x128xbf16, #tpu.memory_space<vmem>>, vector<128x128xbf16>
    %cst_4 = arith.constant dense<0.000000e+00> : vector<8x128xf32>
    %9 = tpu.matmul %7, %8, %cst_4 {dimension_numbers = #tpu.dot_dimension_numbers<[1], [0], [0], [1], [0, 0, 1, 1], [], []>} : vector<8x128xbf16>, vector<128x128xbf16>, vector<8x128xf32> -> vector<8x128xf32>
    %c0_5 = arith.constant 0 : index
    %c0_6 = arith.constant 0 : index
    %10 = vector.load %arg5[%c0_5, %c0_6] : memref<128x32xbf16, #tpu.memory_space<vmem>>, vector<128x32xbf16>
    %cst_7 = arith.constant dense<0.000000e+00> : vector<8x32xf32>
    %11 = tpu.matmul %7, %10, %cst_7 {dimension_numbers = #tpu.dot_dimension_numbers<[1], [0], [0], [1], [0, 0, 1, 1], [], []>} : vector<8x128xbf16>, vector<128x32xbf16>, vector<8x32xf32> -> vector<8x32xf32>
    %12 = arith.truncf %11 : vector<8x32xf32> to vector<8x32xbf16>
    %c0_8 = arith.constant 0 : index
    %c1 = arith.constant 1 : index
    %13 = vector.load %arg1[%c0_8, %c1] : memref<8x2xi32, #tpu.memory_space<vmem>>, vector<8x1xi32>
    %14 = tpu.iota {dimensions = array<i32: 1>} : vector<8x128xi32>
    %15 = vector.broadcast %13 : vector<8x1xi32> to vector<8x128xi32>
    %16 = arith.cmpi eq, %14, %15 : vector<8x128xi32>
    %cst_9 = arith.constant 1.000000e+00 : f32
    %cst_10 = arith.constant 0.000000e+00 : f32
    %17 = vector.broadcast %cst_9 : f32 to vector<8x128xf32>
    %18 = vector.broadcast %cst_10 : f32 to vector<8x128xf32>
    %19 = arith.select %16, %17, %18 : vector<8x128xi1>, vector<8x128xf32>
    %20 = arith.truncf %19 : vector<8x128xf32> to vector<8x128xbf16>
    %c0_11 = arith.constant 0 : index
    %c0_12 = arith.constant 0 : index
    %21 = vector.load %arg4[%c0_11, %c0_12] : memref<128x128xbf16, #tpu.memory_space<vmem>>, vector<128x128xbf16>
    %cst_13 = arith.constant dense<0.000000e+00> : vector<8x128xf32>
    %22 = tpu.matmul %20, %21, %cst_13 {dimension_numbers = #tpu.dot_dimension_numbers<[1], [0], [0], [1], [0, 0, 1, 1], [], []>} : vector<8x128xbf16>, vector<128x128xbf16>, vector<8x128xf32> -> vector<8x128xf32>
    %c0_14 = arith.constant 0 : index
    %c0_15 = arith.constant 0 : index
    %23 = vector.load %arg6[%c0_14, %c0_15] : memref<128x32xbf16, #tpu.memory_space<vmem>>, vector<128x32xbf16>
    %cst_16 = arith.constant dense<0.000000e+00> : vector<8x32xf32>
    %24 = tpu.matmul %20, %23, %cst_16 {dimension_numbers = #tpu.dot_dimension_numbers<[1], [0], [0], [1], [0, 0, 1, 1], [], []>} : vector<8x128xbf16>, vector<128x32xbf16>, vector<8x32xf32> -> vector<8x32xf32>
    %25 = arith.truncf %24 : vector<8x32xf32> to vector<8x32xbf16>
    %c0_17 = arith.constant 0 : index
    %c0_18 = arith.constant 0 : index
    %26 = vector.load %arg17[%c0_17, %c0_18] : memref<1x128xf32, #tpu.memory_space<vmem>>, vector<1x128xf32>
    %27 = arith.mulf %9, %22 : vector<8x128xf32>
    %28 = arith.truncf %26 : vector<1x128xf32> to vector<1x128xbf16>
    %29 = arith.truncf %27 : vector<8x128xf32> to vector<8x128xbf16>
    %cst_19 = arith.constant dense<0.000000e+00> : vector<1x8xf32>
    %30 = tpu.matmul %28, %29, %cst_19 {dimension_numbers = #tpu.dot_dimension_numbers<[1], [1], [0], [0], [0, 0, 1, 0], [], []>} : vector<1x128xbf16>, vector<8x128xbf16>, vector<1x8xf32> -> vector<1x8xf32>
    %c0_20 = arith.constant 0 : index
    %c0_21 = arith.constant 0 : index
    %31 = vector.load %arg7[%c0_20, %c0_21] : memref<32x64xbf16, #tpu.memory_space<vmem>>, vector<32x64xbf16>
    %cst_22 = arith.constant dense<0.000000e+00> : vector<8x64xf32>
    %32 = tpu.matmul %12, %31, %cst_22 {dimension_numbers = #tpu.dot_dimension_numbers<[1], [0], [0], [1], [0, 0, 1, 1], [], []>} : vector<8x32xbf16>, vector<32x64xbf16>, vector<8x64xf32> -> vector<8x64xf32>
    %c0_23 = arith.constant 0 : index
    %c0_24 = arith.constant 0 : index
    %33 = vector.load %arg8[%c0_23, %c0_24] : memref<32x64xbf16, #tpu.memory_space<vmem>>, vector<32x64xbf16>
    %cst_25 = arith.constant dense<0.000000e+00> : vector<8x64xf32>
    %34 = tpu.matmul %25, %33, %cst_25 {dimension_numbers = #tpu.dot_dimension_numbers<[1], [0], [0], [1], [0, 0, 1, 1], [], []>} : vector<8x32xbf16>, vector<32x64xbf16>, vector<8x64xf32> -> vector<8x64xf32>
    %35 = arith.addf %32, %34 : vector<8x64xf32>
    %c0_26 = arith.constant 0 : index
    %c0_27 = arith.constant 0 : index
    %36 = vector.load %arg2[%c0_26, %c0_27] : memref<8x32xbf16, #tpu.memory_space<vmem>>, vector<8x32xbf16>
    %c0_28 = arith.constant 0 : index
    %c0_29 = arith.constant 0 : index
    %37 = vector.load %arg9[%c0_28, %c0_29] : memref<32x64xbf16, #tpu.memory_space<vmem>>, vector<32x64xbf16>
    %cst_30 = arith.constant dense<0.000000e+00> : vector<8x64xf32>
    %38 = tpu.matmul %36, %37, %cst_30 {dimension_numbers = #tpu.dot_dimension_numbers<[1], [0], [0], [1], [0, 0, 1, 1], [], []>} : vector<8x32xbf16>, vector<32x64xbf16>, vector<8x64xf32> -> vector<8x64xf32>
    %39 = arith.addf %35, %38 : vector<8x64xf32>
    %c0_31 = arith.constant 0 : index
    %c0_32 = arith.constant 0 : index
    %40 = vector.load %arg10[%c0_31, %c0_32] : memref<1x64xf32, #tpu.memory_space<vmem>>, vector<1x64xf32>
    %41 = vector.broadcast %40 : vector<1x64xf32> to vector<8x64xf32>
    %42 = arith.addf %39, %41 : vector<8x64xf32>
    %c0_33 = arith.constant 0 : index
    %c0_34 = arith.constant 0 : index
    %43 = vector.load %arg11[%c0_33, %c0_34] : memref<64x32xbf16, #tpu.memory_space<vmem>>, vector<64x32xbf16>
    %c0_35 = arith.constant 0 : index
    %c0_36 = arith.constant 0 : index
    %44 = vector.load %arg12[%c0_35, %c0_36] : memref<1x32xf32, #tpu.memory_space<vmem>>, vector<1x32xf32>
    %c0_37 = arith.constant 0 : index
    %c0_38 = arith.constant 0 : index
    %45 = vector.load %arg13[%c0_37, %c0_38] : memref<32x16xbf16, #tpu.memory_space<vmem>>, vector<32x16xbf16>
    %c0_39 = arith.constant 0 : index
    %c0_40 = arith.constant 0 : index
    %46 = vector.load %arg14[%c0_39, %c0_40] : memref<1x16xf32, #tpu.memory_space<vmem>>, vector<1x16xf32>
    %c0_41 = arith.constant 0 : index
    %c0_42 = arith.constant 0 : index
    %47 = vector.load %arg15[%c0_41, %c0_42] : memref<16x128xbf16, #tpu.memory_space<vmem>>, vector<16x128xbf16>
    %c0_43 = arith.constant 0 : index
    %c0_44 = arith.constant 0 : index
    %48 = vector.load %arg16[%c0_43, %c0_44] : memref<1x128xf32, #tpu.memory_space<vmem>>, vector<1x128xf32>
    %cst_45 = arith.constant 0.000000e+00 : f32
    %49 = vector.broadcast %cst_45 : f32 to vector<8x64xf32>
    %50 = arith.maximumf %42, %49 : vector<8x64xf32>
    %51 = arith.truncf %50 : vector<8x64xf32> to vector<8x64xbf16>
    %cst_46 = arith.constant dense<0.000000e+00> : vector<8x32xf32>
    %52 = tpu.matmul %51, %43, %cst_46 {dimension_numbers = #tpu.dot_dimension_numbers<[1], [0], [0], [1], [0, 0, 1, 1], [], []>} : vector<8x64xbf16>, vector<64x32xbf16>, vector<8x32xf32> -> vector<8x32xf32>
    %53 = vector.broadcast %44 : vector<1x32xf32> to vector<8x32xf32>
    %54 = arith.addf %52, %53 : vector<8x32xf32>
    %cst_47 = arith.constant 0.000000e+00 : f32
    %55 = vector.broadcast %cst_47 : f32 to vector<8x32xf32>
    %56 = arith.maximumf %54, %55 : vector<8x32xf32>
    %57 = arith.truncf %56 : vector<8x32xf32> to vector<8x32xbf16>
    %cst_48 = arith.constant dense<0.000000e+00> : vector<8x16xf32>
    %58 = tpu.matmul %57, %45, %cst_48 {dimension_numbers = #tpu.dot_dimension_numbers<[1], [0], [0], [1], [0, 0, 1, 1], [], []>} : vector<8x32xbf16>, vector<32x16xbf16>, vector<8x16xf32> -> vector<8x16xf32>
    %59 = vector.broadcast %46 : vector<1x16xf32> to vector<8x16xf32>
    %60 = arith.addf %58, %59 : vector<8x16xf32>
    %cst_49 = arith.constant 0.000000e+00 : f32
    %61 = vector.broadcast %cst_49 : f32 to vector<8x16xf32>
    %62 = arith.maximumf %60, %61 : vector<8x16xf32>
    %63 = arith.truncf %62 : vector<8x16xf32> to vector<8x16xbf16>
    %cst_50 = arith.constant dense<0.000000e+00> : vector<8x128xf32>
    %64 = tpu.matmul %63, %47, %cst_50 {dimension_numbers = #tpu.dot_dimension_numbers<[1], [0], [0], [1], [0, 0, 1, 1], [], []>} : vector<8x16xbf16>, vector<16x128xbf16>, vector<8x128xf32> -> vector<8x128xf32>
    %65 = vector.broadcast %48 : vector<1x128xf32> to vector<8x128xf32>
    %66 = arith.addf %64, %65 : vector<8x128xf32>
    %c0_51 = arith.constant 0 : index
    %c0_52 = arith.constant 0 : index
    %67 = vector.load %arg18[%c0_51, %c0_52] : memref<1x128xf32, #tpu.memory_space<vmem>>, vector<1x128xf32>
    %68 = arith.truncf %67 : vector<1x128xf32> to vector<1x128xbf16>
    %69 = arith.truncf %66 : vector<8x128xf32> to vector<8x128xbf16>
    %cst_53 = arith.constant dense<0.000000e+00> : vector<1x8xf32>
    %70 = tpu.matmul %68, %69, %cst_53 {dimension_numbers = #tpu.dot_dimension_numbers<[1], [1], [0], [0], [0, 0, 1, 0], [], []>} : vector<1x128xbf16>, vector<8x128xbf16>, vector<1x8xf32> -> vector<1x8xf32>
    %71 = arith.addf %30, %70 : vector<1x8xf32>
    %c0_54 = arith.constant 0 : index
    %c0_55 = arith.constant 0 : index
    %72 = vector.load %arg19[%c0_54, %c0_55] : memref<1x1xf32, #tpu.memory_space<vmem>>, vector<1x1xf32>
    %73 = vector.broadcast %72 : vector<1x1xf32> to vector<1x8xf32>
    %74 = arith.addf %71, %73 : vector<1x8xf32>
    %c0_56 = arith.constant 0 : index
    %c0_57 = arith.constant 0 : index
    %75 = vector.load %arg20[%c0_56, %c0_57] : memref<1x8xf32, #tpu.memory_space<vmem>>, vector<1x8xf32>
    tpu.vector_store %arg20[%c0_56, %c0_57], %74 {strides = array<i32>} : memref<1x8xf32, #tpu.memory_space<vmem>>, vector<1x8xf32>,
    return
  }
  func.func @transform_0(%arg0: i32) -> (i32, i32) {
    %c0_i32 = arith.constant 0 : i32
    %c0_i32_0 = arith.constant 0 : i32
    return %arg0, %c0_i32 : i32, i32
  }
  func.func @transform_1(%arg0: i32) -> (i32, i32) {
    %c0_i32 = arith.constant 0 : i32
    %c0_i32_0 = arith.constant 0 : i32
    return %arg0, %c0_i32 : i32, i32
  }
  func.func @transform_2(%arg0: i32) -> (i32, i32) {
    %c0_i32 = arith.constant 0 : i32
    %c0_i32_0 = arith.constant 0 : i32
    %c0_i32_1 = arith.constant 0 : i32
    return %c0_i32, %c0_i32_0 : i32, i32
  }
  func.func @transform_3(%arg0: i32) -> (i32, i32) {
    %c0_i32 = arith.constant 0 : i32
    %c0_i32_0 = arith.constant 0 : i32
    %c0_i32_1 = arith.constant 0 : i32
    return %c0_i32, %c0_i32_0 : i32, i32
  }
  func.func @transform_4(%arg0: i32) -> (i32, i32) {
    %c0_i32 = arith.constant 0 : i32
    %c0_i32_0 = arith.constant 0 : i32
    %c0_i32_1 = arith.constant 0 : i32
    return %c0_i32, %c0_i32_0 : i32, i32
  }
  func.func @transform_5(%arg0: i32) -> (i32, i32) {
    %c0_i32 = arith.constant 0 : i32
    %c0_i32_0 = arith.constant 0 : i32
    %c0_i32_1 = arith.constant 0 : i32
    return %c0_i32, %c0_i32_0 : i32, i32
  }
  func.func @transform_6(%arg0: i32) -> (i32, i32) {
    %c0_i32 = arith.constant 0 : i32
    %c0_i32_0 = arith.constant 0 : i32
    %c0_i32_1 = arith.constant 0 : i32
    return %c0_i32, %c0_i32_0 : i32, i32
  }
  func.func @transform_7(%arg0: i32) -> (i32, i32) {
    %c0_i32 = arith.constant 0 : i32
    %c0_i32_0 = arith.constant 0 : i32
    %c0_i32_1 = arith.constant 0 : i32
    return %c0_i32, %c0_i32_0 : i32, i32
  }
  func.func @transform_8(%arg0: i32) -> (i32, i32) {
    %c0_i32 = arith.constant 0 : i32
    %c0_i32_0 = arith.constant 0 : i32
    %c0_i32_1 = arith.constant 0 : i32
    return %c0_i32, %c0_i32_0 : i32, i32
  }
  func.func @transform_9(%arg0: i32) -> (i32, i32) {
    %c0_i32 = arith.constant 0 : i32
    %c0_i32_0 = arith.constant 0 : i32
    %c0_i32_1 = arith.constant 0 : i32
    return %c0_i32, %c0_i32_0 : i32, i32
  }
  func.func @transform_10(%arg0: i32) -> (i32, i32) {
    %c0_i32 = arith.constant 0 : i32
    %c0_i32_0 = arith.constant 0 : i32
    %c0_i32_1 = arith.constant 0 : i32
    return %c0_i32, %c0_i32_0 : i32, i32
  }
  func.func @transform_11(%arg0: i32) -> (i32, i32) {
    %c0_i32 = arith.constant 0 : i32
    %c0_i32_0 = arith.constant 0 : i32
    %c0_i32_1 = arith.constant 0 : i32
    return %c0_i32, %c0_i32_0 : i32, i32
  }
  func.func @transform_12(%arg0: i32) -> (i32, i32) {
    %c0_i32 = arith.constant 0 : i32
    %c0_i32_0 = arith.constant 0 : i32
    %c0_i32_1 = arith.constant 0 : i32
    return %c0_i32, %c0_i32_0 : i32, i32
  }
  func.func @transform_13(%arg0: i32) -> (i32, i32) {
    %c0_i32 = arith.constant 0 : i32
    %c0_i32_0 = arith.constant 0 : i32
    %c0_i32_1 = arith.constant 0 : i32
    return %c0_i32, %c0_i32_0 : i32, i32
  }
  func.func @transform_14(%arg0: i32) -> (i32, i32) {
    %c0_i32 = arith.constant 0 : i32
    %c0_i32_0 = arith.constant 0 : i32
    %c0_i32_1 = arith.constant 0 : i32
    return %c0_i32, %c0_i32_0 : i32, i32
  }
  func.func @transform_15(%arg0: i32) -> (i32, i32) {
    %c0_i32 = arith.constant 0 : i32
    %c0_i32_0 = arith.constant 0 : i32
    %c0_i32_1 = arith.constant 0 : i32
    return %c0_i32, %c0_i32_0 : i32, i32
  }
  func.func @transform_16(%arg0: i32) -> (i32, i32) {
    %c0_i32 = arith.constant 0 : i32
    %c0_i32_0 = arith.constant 0 : i32
    %c0_i32_1 = arith.constant 0 : i32
    return %c0_i32, %c0_i32_0 : i32, i32
  }
  func.func @transform_17(%arg0: i32) -> (i32, i32) {
    %c0_i32 = arith.constant 0 : i32
    %c0_i32_0 = arith.constant 0 : i32
    %c0_i32_1 = arith.constant 0 : i32
    return %c0_i32, %c0_i32_0 : i32, i32
  }
  func.func @transform_18(%arg0: i32) -> (i32, i32) {
    %c0_i32 = arith.constant 0 : i32
    %c0_i32_0 = arith.constant 0 : i32
    %c0_i32_1 = arith.constant 0 : i32
    return %c0_i32, %c0_i32_0 : i32, i32
  }
  func.func @transform_19(%arg0: i32) -> (i32, i32) {
    %c0_i32 = arith.constant 0 : i32
    %c0_i32_0 = arith.constant 0 : i32
    return %c0_i32, %arg0 : i32, i32
  }
}

</mosaic_0001>

<bundles_post_ra>
// kernel: ncf_forward.1
= control target key start
LH: loop header
LB: loop body
LE: loop exit
PB: predicated region body
PF: predicated region fallthrough
CT: control target
= control target key end

     0   :  { %s1719_s0 = inlined_call_operand.vmem [shape: s32[8,2], index: 0, kind: input, shape index: {}]   ;;  %s1720_s1 = inlined_call_operand.vmem [shape: bf16[8,32], index: 1, kind: input, shape index: {}]   ;;  %s1721_s2 = inlined_call_operand.vmem [shape: bf16[128,128], index: 2, kind: input, shape index: {}]   ;;  %s1722_s3 = inlined_call_operand.vmem [shape: bf16[128,128], index: 3, kind: input, shape index: {}]   ;;  %s1723_s4 = inlined_call_operand.vmem [shape: bf16[128,32], index: 4, kind: input, shape index: {}]   ;;  %s1724_s5 = inlined_call_operand.vmem [shape: bf16[128,32], index: 5, kind: input, shape index: {}]   ;;  %s1725_s6 = inlined_call_operand.vmem [shape: bf16[32,64], index: 6, kind: input, shape index: {}]   ;;  %s1726_s7 = inlined_call_operand.vmem [shape: bf16[32,64], index: 7, kind: input, shape index: {}]   ;;  %s1727_s8 = inlined_call_operand.vmem [shape: bf16[32,64], index: 8, kind: input, shape index: {}]   ;;  %s1728_s9 = inlined_call_operand.vmem [shape: f32[1,64], index: 9, kind: input, shape index: {}]   ;;  %s1729_s10 = inlined_call_operand.vmem [shape: bf16[64,32], index: 10, kind: input, shape index: {}]   ;;  %s1730_s11 = inlined_call_operand.vmem [shape: f32[1,32], index: 11, kind: input, shape index: {}]   ;;  %s1731_s12 = inlined_call_operand.vmem [shape: bf16[32,16], index: 12, kind: input, shape index: {}]   ;;  %s1732_s13 = inlined_call_operand.vmem [shape: f32[1,16], index: 13, kind: input, shape index: {}]   ;;  %s1733_s14 = inlined_call_operand.vmem [shape: bf16[16,128], index: 14, kind: input, shape index: {}]   ;;  %s1734_s15 = inlined_call_operand.vmem [shape: f32[1,128], index: 15, kind: input, shape index: {}]   ;;  %s1735_s16 = inlined_call_operand.vmem [shape: f32[1,128], index: 16, kind: input, shape index: {}]   ;;  %s1736_s17 = inlined_call_operand.vmem [shape: f32[1,128], index: 17, kind: input, shape index: {}]   ;;  %s1737_s18 = inlined_call_operand.<no memory space> [shape: f32[1,1], index: 18, kind: input, shape index: {}]   ;;  %s1738_s19 = inlined_call_operand.hbm [shape: f32[1,8], index: 19, kind: output, shape index: {}]  }
   0x1   :  { %1741 = sst [smem:[#allocation6_spill]] %s1719_s0  ;;  %v24_v0 = vstv %s1737_s18 }
   0x2   :  { %1742 = sst [smem:[#allocation7_spill]] %s1720_s1  ;;  %25 = vst [vmem:[#allocation2] sm:$0x1] %v24_v0 }
   0x3   :  { %1743 = sst [smem:[#allocation8_spill]] %s1721_s2 }
   0x4   :  { %1744 = sst [smem:[#allocation9_spill]] %s1722_s3 }
   0x5   :  { %s1745_s1 = sld [smem:[#allocation6_spill]]  ;;  %v1358_v2 = vmov 0   ;;  %v1359_v3 = vmov 0.0   ;;  %s1746_s23 = sld [smem:[#allocation8_spill]]  ;;  %v1290_v5 = vld [vmem:[%s1723_s4] sm:$0xff]   ;;  %v1292_v7 = vld [vmem:[%s1723_s4 + $0x8] sm:$0xff]  }
   0x6   :  { %1285 = vset.pattern.permute.xlu0 %v1358_v2  ;;  %1137 = vmatprep.subr.bf16.mxu0 %v1359_v3  ;;  %vm1360_vm0 = vmmov 0   ;;  %v1361_v8 = vmov 1   ;;  %v1294_v10 = vld [vmem:[%s1723_s4 + $0x10] sm:$0xff]   ;;  %v1296_v12 = vld [vmem:[%s1723_s4 + $0x18] sm:$0xff]   ;;  %v1298_v14 = vld [vmem:[%s1723_s4 + $0x20] sm:$0xff]  }
   0x7   :  { %1157 = vmatprep.subr.bf16.mxu1 %v1359_v3  ;;  %1287 = vset.pattern.permute.xlu1 %v1358_v2  ;;  %v1300_v16 = vld [vmem:[%s1723_s4 + $0x28] sm:$0xff]   ;;  %v1302_v18 = vld [vmem:[%s1723_s4 + $0x30] sm:$0xff]   ;;  %v1304_v20 = vld [vmem:[%s1723_s4 + $0x38] sm:$0xff]  }
   0x8   :  { %1158 = vmatpush3.bf16.msra.mxu1 %v1290_v5  ;;  %1153 = vmatprep.mubr.msk.bf16.mxu0 %vm1360_vm0, %v1359_v3 }
   0x9   :  { %1159 = vmatprep.subr.bf16.mxu1 %v1359_v3  ;;  %1173 = vmatprep.mubr.msk.bf16.mxu1 %vm1360_vm0, %v1359_v3 }
   0xb   :  { %v66_v1 = vld [vmem:[%s1745_s1] sm:$0xff]  ;;  %v1291_v6 = vld [vmem:[%s1746_s23 + $0x8] sm:$0xff]   ;;  %v1293_v9 = vld [vmem:[%s1746_s23 + $0x10] sm:$0xff]  }
   0xc   :  { %v1289_v4 = vld [vmem:[%s1746_s23] sm:$0xff]   ;;  %70 = vperm.xlu0 %1285, %v66_v1   ;;  %1160 = vmatpush3.bf16.msra.mxu1 %v1292_v7  ;;  %v1295_v11 = vld [vmem:[%s1746_s23 + $0x18] sm:$0xff]   ;;  %v1299_v15 = vld [vmem:[%s1746_s23 + $0x28] sm:$0xff]  }
   0xd   :  { %1138 = vmatpush3.bf16.msra.mxu0 %v1289_v4  ;;  %1161 = vmatprep.subr.bf16.mxu1 %v1359_v3  ;;  %v1297_v13 = vld [vmem:[%s1746_s23 + $0x20] sm:$0xff]   ;;  %v1301_v17 = vld [vmem:[%s1746_s23 + $0x30] sm:$0xff]   ;;  %v1303_v19 = vld [vmem:[%s1746_s23 + $0x38] sm:$0xff]  }
   0xe   :  { %1139 = vmatprep.subr.bf16.mxu0 %v1359_v3 }
  0x10   :  { %1286 = vset.pattern.permute.xlu0 %v1361_v8  ;;  %1162 = vmatpush3.bf16.msra.mxu1 %v1294_v10 }
  0x11   :  { %285 = vperm.xlu0 %1286, %v66_v1   ;;  %1140 = vmatpush3.bf16.msra.mxu0 %v1291_v6 }
  0x12   :  { %1141 = vmatprep.subr.bf16.mxu0 %v1359_v3  ;;  %1163 = vmatprep.subr.bf16.mxu1 %v1359_v3 }
  0x14   :  { %1164 = vmatpush3.bf16.msra.mxu1 %v1296_v12 }
  0x15   :  { %1142 = vmatpush3.bf16.msra.mxu0 %v1293_v9  ;;  %1288 = vset.pattern.permute.xlu0 %v1358_v2 }
  0x16   :  { %1143 = vmatprep.subr.bf16.mxu0 %v1359_v3  ;;  %1165 = vmatprep.subr.bf16.mxu1 %v1359_v3 }
  0x18   :  { %1166 = vmatpush3.bf16.msra.mxu1 %v1298_v14 }
  0x19   :  { %1144 = vmatpush3.bf16.msra.mxu0 %v1295_v11  ;;  %1167 = vmatprep.subr.bf16.mxu1 %v1359_v3 }
  0x1a   :  { %1145 = vmatprep.subr.bf16.mxu0 %v1359_v3 }
  0x1c   :  { %1168 = vmatpush3.bf16.msra.mxu1 %v1300_v16 }
  0x1d   :  { %1146 = vmatpush3.bf16.msra.mxu0 %v1297_v13  ;;  %1169 = vmatprep.subr.bf16.mxu1 %v1359_v3 }
  0x1e   :  { %1147 = vmatprep.subr.bf16.mxu0 %v1359_v3 }
  0x20   :  { %1170 = vmatpush3.bf16.msra.mxu1 %v1302_v18 }
  0x21   :  { %1148 = vmatpush3.bf16.msra.mxu0 %v1299_v15  ;;  %1171 = vmatprep.subr.bf16.mxu1 %v1359_v3 }
  0x22   :  { %1149 = vmatprep.subr.bf16.mxu0 %v1359_v3 }
  0x24   :  { %1172 = vmatpush3.bf16.msra.mxu1 %v1304_v20 }
  0x25   :  { %1150 = vmatpush3.bf16.msra.mxu0 %v1301_v17  ;;  %1197 = vmatprep.subr.bf16.mxu1 %v1359_v3 }
  0x26   :  { %1151 = vmatprep.subr.bf16.mxu0 %v1359_v3 }
  0x29   :  { %1152 = vmatpush3.bf16.msra.mxu0 %v1303_v19 }
  0x2a   :  { %1177 = vmatprep.subr.bf16.mxu0 %v1359_v3 }
  0x2b   :  { %26 = vsyncpa [#allocation4], 0  ;;  %v67_v21 = vlaneseq  ;;  %s1747_s25 = sld [smem:[#allocation9_spill]]  ;;  %v1306_v25 = vld [vmem:[%s1724_s5] sm:$0xff]   ;;  %v1362_v26 = vmov 1.0|1.0  }
  0x2c   :  { %v1308_v28 = vld [vmem:[%s1724_s5 + $0x8] sm:$0xff]   ;;  %v1310_v30 = vld [vmem:[%s1724_s5 + $0x10] sm:$0xff]   ;;  %v1312_v32 = vld [vmem:[%s1724_s5 + $0x18] sm:$0xff]   ;;  %vm523_vm5 = vcmask 261120   ;;  %s1748_s30 = sld [smem:[#allocation7_spill]]  ;;  %vm740_vm6 = vcmask 523264  }
  0x2d   :  { %v68_v22 = vand.u32 127, %v67_v21  ;;  %v1314_v34 = vld [vmem:[%s1724_s5 + $0x20] sm:$0xff]   ;;  %v1316_v36 = vld [vmem:[%s1724_s5 + $0x28] sm:$0xff]   ;;  %v1318_v38 = vld [vmem:[%s1724_s5 + $0x30] sm:$0xff]   ;;  %vm861_vm7 = vcmask 130048   ;;  %vm999_vm8 = vcmask 57344  }
  0x2e   :  { %v1320_v41 = vld [vmem:[%s1724_s5 + $0x38] sm:$0xff]   ;;  %v1321_v42 = vld [vmem:[%s1725_s6] sm:$0xff]   ;;  %v1322_v43 = vld [vmem:[%s1725_s6 + $0x8] sm:$0xff]  }
  0x2f   :  { %v1323_v44 = vld [vmem:[%s1726_s7] sm:$0xff]   ;;  %v1324_v45 = vld [vmem:[%s1726_s7 + $0x8] sm:$0xff]   ;;  %v1329_v7 = vld [vmem:[%s1729_s10 + $0x10] sm:$0xff]  }
  0x30   :  { %v1325_v57 = vld [vmem:[%s1727_s8] sm:$0xff]   ;;  %v1326_v2 = vld [vmem:[%s1727_s8 + $0x8] sm:$0xff]   ;;  %v1330_v8 = vld [vmem:[%s1729_s10 + $0x18] sm:$0xff]  }
  0x31   :  { %v1305_v24 = vld [vmem:[%s1747_s25] sm:$0xff]   ;;  %v1307_v27 = vld [vmem:[%s1747_s25 + $0x8] sm:$0xff]   ;;  %v1309_v29 = vld [vmem:[%s1747_s25 + $0x10] sm:$0xff]  }
  0x32   :  { %v1311_v31 = vld [vmem:[%s1747_s25 + $0x18] sm:$0xff]   ;;  %v1313_v33 = vld [vmem:[%s1747_s25 + $0x20] sm:$0xff]   ;;  %v1315_v35 = vld [vmem:[%s1747_s25 + $0x28] sm:$0xff]  }
  0x33   :  { %v1317_v37 = vld [vmem:[%s1747_s25 + $0x30] sm:$0xff]   ;;  %v1319_v40 = vld [vmem:[%s1747_s25 + $0x38] sm:$0xff]   ;;  %v622_v4 = vld [vmem:[%s1748_s30] sm:$0xf] }
  0x34   :  { %v1327_v5 = vld [vmem:[%s1729_s10] sm:$0xff]   ;;  %v1328_v6 = vld [vmem:[%s1729_s10 + $0x8] sm:$0xff]  }
  0x35   :  { %v1064_v19 = vld [vmem:[%s1728_s9] ss:$0 sm:$0xff] }
  0x8b   :  { %v71_v23 = vpop.permute.xlu0 %70 }
  0x8c   :  { %vm72_vm1 = vcmp.eq.s32.totalorder %v68_v22, %v71_v23 }
  0x8d   :  { %vm1023_vm2 = vmpackc.low %vm72_vm1, %vm72_vm1 }
  0x8e   :  { %1154 = vmatmul.mubr.msk.bf16.vlgmr.msra.gmra.mrb[0].mxu0 %vm1023_vm2, %v1362_v26  ;;  %1174 = vmatmul.mubr.msk.bf16.vlgmr.msra.gmra.mrb[0].mxu1 %vm1023_vm2, %v1362_v26 }
  0x8f   :  { %1178 = vmatpush3.bf16.msra.mxu0 %v1305_v24  ;;  %1198 = vmatpush3.bf16.msra.mxu1 %v1306_v25 }
  0x90   :  { %1179 = vmatprep.subr.bf16.mxu0 %v1359_v3  ;;  %1199 = vmatprep.subr.bf16.mxu1 %v1359_v3  ;;  %v286_v39 = vpop.permute.xlu0 %285 }
  0x91   :  { %1193 = vmatprep.mubr.msk.bf16.mxu0 %vm1360_vm0, %v1359_v3  ;;  %1213 = vmatprep.mubr.msk.bf16.mxu1 %vm1360_vm0, %v1359_v3  ;;  %vm287_vm3 = vcmp.eq.s32.totalorder %v68_v22, %v286_v39  ;;  %v1071_v39 = vld [vmem:[%s1732_s13] ss:$0 sm:$0xff] }
  0x92   :  { %vm1043_vm4 = vmpackc.low %vm287_vm3, %vm287_vm3 }
  0x93   :  { %1180 = vmatpush3.bf16.msra.mxu0 %v1307_v27  ;;  %1200 = vmatpush3.bf16.msra.mxu1 %v1308_v28  ;;  %v1331_v28 = vld [vmem:[%s1731_s12] sm:$0xff]  }
  0x94   :  { %1181 = vmatprep.subr.bf16.mxu0 %v1359_v3  ;;  %1201 = vmatprep.subr.bf16.mxu1 %v1359_v3 }
  0x97   :  { %1182 = vmatpush3.bf16.msra.mxu0 %v1309_v29  ;;  %1202 = vmatpush3.bf16.msra.mxu1 %v1310_v30  ;;  %v1332_v29 = vld [vmem:[%s1731_s12 + $0x8] sm:$0xff]   ;;  %v1065_v30 = vld [vmem:[%s1730_s11] ss:$0 sm:$0xff] }
  0x98   :  { %1183 = vmatprep.subr.bf16.mxu0 %v1359_v3  ;;  %1203 = vmatprep.subr.bf16.mxu1 %v1359_v3 }
  0x9b   :  { %1184 = vmatpush3.bf16.msra.mxu0 %v1311_v31  ;;  %1204 = vmatpush3.bf16.msra.mxu1 %v1312_v32 }
  0x9c   :  { %1185 = vmatprep.subr.bf16.mxu0 %v1359_v3  ;;  %1205 = vmatprep.subr.bf16.mxu1 %v1359_v3 }
  0x9f   :  { %1186 = vmatpush3.bf16.msra.mxu0 %v1313_v33  ;;  %1206 = vmatpush3.bf16.msra.mxu1 %v1314_v34 }
  0xa0   :  { %1187 = vmatprep.subr.bf16.mxu0 %v1359_v3  ;;  %1207 = vmatprep.subr.bf16.mxu1 %v1359_v3 }
  0xa3   :  { %1188 = vmatpush3.bf16.msra.mxu0 %v1315_v35  ;;  %1208 = vmatpush3.bf16.msra.mxu1 %v1316_v36 }
  0xa4   :  { %1189 = vmatprep.subr.bf16.mxu0 %v1359_v3  ;;  %1209 = vmatprep.subr.bf16.mxu1 %v1359_v3 }
  0xa7   :  { %1190 = vmatpush3.bf16.msra.mxu0 %v1317_v37  ;;  %1210 = vmatpush3.bf16.msra.mxu1 %v1318_v38  ;;  %v1333_v37 = vld [vmem:[%s1733_s14] sm:$0xff]  }
  0xa8   :  { %1191 = vmatprep.subr.bf16.mxu0 %v1359_v3  ;;  %1211 = vmatprep.subr.bf16.mxu1 %v1359_v3 }
  0xab   :  { %1192 = vmatpush3.bf16.msra.mxu0 %v1319_v40  ;;  %1212 = vmatpush3.bf16.msra.mxu1 %v1320_v41 }
  0xac   :  { %1225 = vmatprep.subr.bf16.mxu1 %v1359_v3  ;;  %1217 = vmatprep.subr.bf16.mxu0 %v1359_v3 }
  0xae   :  { %1194 = vmatmul.mubr.msk.bf16.vlgmr.msra.gmra.mrb[4].mxu0 %vm1043_vm4, %v1362_v26  ;;  %1214 = vmatmul.mubr.msk.bf16.vlgmr.msra.gmra.mrb[4].mxu1 %vm1043_vm4, %v1362_v26 }
  0xaf   :  { %1226 = vmatpush3.bf16.msra.mxu1 %v1321_v42  ;;  %1229 = vmatprep.mubr.msk.bf16.mxu1 %vm1360_vm0, %v1359_v3 }
  0xb0   :  { %1227 = vmatprep.subr.bf16.mxu1 %v1359_v3  ;;  %1221 = vmatprep.mubr.msk.bf16.mxu0 %vm1360_vm0, %v1359_v3 }
  0xb1   :  { %1218 = vmatpush3.bf16.msra.mxu0 %v1323_v44 }
  0xb2   :  { %1219 = vmatprep.subr.bf16.mxu0 %v1359_v3 }
  0xb3   :  { %1228 = vmatpush3.bf16.msra.mxu1 %v1322_v43 }
  0xb4   :  { %1241 = vmatprep.subr.bf16.mxu1 %v1359_v3 }
  0xb5   :  { %1220 = vmatpush3.bf16.msra.mxu0 %v1324_v45 }
  0xb6   :  { %1233 = vmatprep.subr.bf16.mxu0 %v1359_v3 }
 0x161   :  { %v173_v46 = vpop.f32.mrb[0].mxu0  ;;  %v277_v47 = vpop.f32.mrb[0].mxu1 }
 0x162   :  { %v283_v48 = vpack.c.bf16 %v277_v47, %v277_v47  ;;  %v1155_v49 = vpop.f32.mrb[1].mxu0  ;;  %v1175_v50 = vpop.f32.mrb[1].mxu1 }
 0x163   :  { %v176_v51 = vpop.f32.mrb[2].mxu0  ;;  %v280_v52 = vpop.f32.mrb[2].mxu1  ;;  %v988_v50 = vld [vmem:[#allocation2] sm:$0x1] }
 0x164   :  { %v1156_v53 = vpop.f32.mrb[3].mxu0  ;;  %v1176_v54 = vpop.f32.mrb[3].mxu1  ;;  %1230 = vmatmul.mubr.msk.bf16.vlgmr.msra.gmra.mrb[8].mxu1 %vm523_vm5, %v283_v48  ;;  %v499_v48 = vld [vmem:[%s1735_s16] sm:$0x1]  ;;  %991 = vperm.xlu1 %1287, %v988_v50  }
 0x165   :  { %1249 = vmatprep.mubr.msk.bf16.mxu1 %vm1360_vm0, %v1359_v3  ;;  %1242 = vmatpush3.bf16.msra.mxu1 %v1327_v5  ;;  %v501_v49 = vpack.c.bf16 %v499_v48, %v499_v48  ;;  %v1075_v51 = vld [vmem:[%s1734_s15] ss:$0 sm:$0xff]  ;;  %s1363_s15 = smov [#allocation3]  }
 0x166   :  { %1243 = vmatprep.subr.bf16.mxu1 %v1359_v3  ;;  %s1007_s16 = sshll.u32 %s1363_s15, 4  ;;  %s1008_s16 = int_to_ptr.vmem [resolvable:$true] %s1007_s16 }
 0x167   :  { %s1338_s30 = scalar_lea.vmem %s1008_s16, 32  ;;  %p1339_p1 = scmp.lt.s32.totalorder %s1008_s16, %s1008_s16 }
 0x169   :  { %1244 = vmatpush3.bf16.msra.mxu1 %v1328_v6 }
 0x16a   :  { %1245 = vmatprep.subr.bf16.mxu1 %v1359_v3 }
 0x16d   :  { %1246 = vmatpush3.bf16.msra.mxu1 %v1329_v7 }
 0x16e   :  { %1247 = vmatprep.subr.bf16.mxu1 %v1359_v3 }
 0x171   :  { %1248 = vmatpush3.bf16.msra.mxu1 %v1330_v8 }
 0x172   :  { %1267 = vmatprep.subr.bf16.mxu1 %v1359_v3 }
 0x181   :  { %v388_v55 = vpop.f32.mrb[4].mxu0  ;;  %v492_v56 = vpop.f32.mrb[4].mxu1 }
 0x182   :  { %v1635_v58 = vmul.f32 %v388_v55, %v173_v46  ;;  %v498_v59 = vpack.c.bf16 %v492_v56, %v492_v56  ;;  %v1195_v60 = vpop.f32.mrb[5].mxu0  ;;  %v1215_v61 = vpop.f32.mrb[5].mxu1 }
 0x183   :  { %v391_v62 = vpop.f32.mrb[6].mxu0  ;;  %v495_v63 = vpop.f32.mrb[6].mxu1 }
 0x184   :  { %v1196_v0 = vpop.f32.mrb[7].mxu0  ;;  %v1216_v1 = vpop.f32.mrb[7].mxu1  ;;  %1222 = vmatmul.mubr.msk.bf16.vlgmr.msra.gmra.mrb[8].mxu0 %vm523_vm5, %v498_v59  ;;  %v502_v47 = vpack.c.bf16 %v1635_v58, %v1635_v58  ;;  %v995_v63 = vshrl.u32 %v67_v21, 7 }
 0x185   :  { %1234 = vmatpush3.bf16.msra.mxu0 %v1325_v57  ;;  %1237 = vmatprep.mubr.msk.bf16.mxu0 %vm1360_vm0, %v1359_v3 }
 0x186   :  { %1235 = vmatprep.subr.bf16.mxu0 %v1359_v3  ;;  %v996_v0 = vsub.s32 0, %v995_v63 }
 0x189   :  { %1236 = vmatpush3.bf16.msra.mxu0 %v1326_v2 }
 0x18a   :  { %1253 = vmatprep.subr.bf16.mxu0 %v1359_v3 }
 0x18c   :  { %1238 = vmatmul.mubr.msk.bf16.vlgmr.msra.gmra.mrb[12].mxu0 %vm523_vm5, %v622_v4 }
 0x18d   :  { %1257 = vmatprep.mubr.msk.bf16.mxu0 %vm1360_vm0, %v1359_v3  ;;  %1254 = vmatpush3.bf16.msra.mxu0 %v1331_v28 }
 0x18e   :  { %1255 = vmatprep.subr.bf16.mxu0 %v1359_v3 }
 0x191   :  { %1256 = vmatpush3.bf16.msra.mxu0 %v1332_v29 }
 0x192   :  { %1261 = vmatprep.subr.bf16.mxu0 %v1359_v3 }
 0x1e3   :  { %v992_v1 = vpop.permute.xlu1 %991 }
 0x1e4   :  { %v997_v2 = vrot.slane %v992_v1, %v996_v0 }
 0x237   :  { %v616_v9 = vpop.f32.mrb[8].mxu1 }
 0x238   :  { %v1231_v10 = vpop.f32.mrb[9].mxu1 }
 0x239   :  { %v619_v11 = vpop.f32.mrb[10].mxu1 }
 0x23a   :  { %v1232_v12 = vpop.f32.mrb[11].mxu1 }
 0x257   :  { %v561_v13 = vpop.f32.mrb[8].mxu0 }
 0x258   :  { %v617_v14 = vadd.f32 %v616_v9, %v561_v13  ;;  %v1223_v15 = vpop.f32.mrb[9].mxu0 }
 0x259   :  { %v564_v16 = vpop.f32.mrb[10].mxu0 }
 0x25a   :  { %v1224_v17 = vpop.f32.mrb[11].mxu0 }
 0x25f   :  { %v676_v18 = vpop.f32.mrb[12].mxu0 }
 0x260   :  { %v682_v20 = vadd.f32 %v676_v18, %v617_v14  ;;  %v1239_v22 = vpop.f32.mrb[13].mxu0 }
 0x261   :  { %v679_v23 = vpop.f32.mrb[14].mxu0 }
 0x262   :  { %v690_v24 = vadd.f32 %v1064_v19, %v682_v20  ;;  %v1240_v25 = vpop.f32.mrb[15].mxu0 }
 0x264   :  { %v708_v26 = vmax.f32 %v690_v24, 0.0 }
 0x266   :  { %v709_v27 = vpack.c.bf16 %v708_v26, %v708_v26 }
 0x268   :  { %1250 = vmatmul.mubr.msk.bf16.vlgmr.msra.gmra.mrb[12].mxu1 %vm740_vm6, %v709_v27 }
 0x269   :  { %1269 = vmatprep.mubr.msk.bf16.mxu1 %vm1360_vm0, %v1359_v3 }
 0x33b   :  { %v778_v31 = vpop.f32.mrb[12].mxu1 }
 0x33c   :  { %v779_v32 = vadd.f32 %v1065_v30, %v778_v31  ;;  %v1251_v33 = vpop.f32.mrb[13].mxu1 }
 0x33d   :  { %v781_v34 = vpop.f32.mrb[14].mxu1 }
 0x33e   :  { %v784_v35 = vmax.f32 %v779_v32, 0.0  ;;  %v1252_v36 = vpop.f32.mrb[15].mxu1 }
 0x340   :  { %v785_v38 = vpack.c.bf16 %v784_v35, %v784_v35 }
 0x342   :  { %1258 = vmatmul.mubr.msk.bf16.vlgmr.msra.gmra.mrb[16].mxu0 %vm523_vm5, %v785_v38 }
 0x343   :  { %1262 = vmatpush3.bf16.msra.mxu0 %v1333_v37  ;;  %1263 = vmatprep.mubr.msk.bf16.mxu0 %vm1360_vm0, %v1359_v3 }
 0x344   :  { %1273 = vmatprep.subr.bf16.mxu0 %v1359_v3 }
 0x415   :  { %v841_v40 = vpop.f32.mrb[16].mxu0 }
 0x416   :  { %v842_v41 = vadd.f32 %v1071_v39, %v841_v40  ;;  %v1259_v42 = vpop.f32.mrb[17].mxu0 }
 0x417   :  { %v844_v43 = vpop.f32.mrb[18].mxu0 }
 0x418   :  { %v847_v44 = vmax.f32 %v842_v41, 0.0  ;;  %v1260_v45 = vpop.f32.mrb[19].mxu0 }
 0x41a   :  { %v848_v46 = vpack.c.bf16 %v847_v44, %v847_v44 }
 0x41c   :  { %1264 = vmatmul.mubr.msk.bf16.vlgmr.msra.gmra.mrb[20].mxu0 %vm861_vm7, %v848_v46 }
 0x41d   :  { %1274 = vmatpush3.bf16.xpose.msra.mxu0 %v502_v47  ;;  %1275 = vmatprep.mubr.msk.bf16.mxu0 %vm1360_vm0, %v1359_v3  ;;  %v905_v3 = vld [vmem:[%s1736_s17] sm:$0x1]  ;;  %s1334_s17 = scalar_lea.vmem %s1008_s16, 16 }
 0x41e   :  { %v906_v58 = vpack.c.bf16 %v905_v3, %v905_v3  ;;  %p1335_p0 = scmp.ne.s32.totalorder %s1008_s16, %s1334_s17  ;;  %p1340_p2 = scmp.lt.s32.totalorder %s1338_s30, %s1334_s17 }
 0x420   :  { %p1341_p3 = por %p1340_p2, %p1339_p1 }
 0x422   :  { %p1342_p4 = pnand %p1341_p3, %p1335_p0 }
 0x424   :  { %1276 = vmatmul.mubr.bf16.vlgmr.msra.gmra.mrb[24].mxu0 %v501_v49 }
 0x4ef   :  { %v899_v52 = vpop.f32.mrb[20].mxu0 }
 0x4f0   :  { %v900_v53 = vadd.f32 %v1075_v51, %v899_v52  ;;  %v1265_v54 = vpop.f32.mrb[21].mxu0 }
 0x4f1   :  { %v902_v55 = vpop.f32.mrb[22].mxu0 }
 0x4f2   :  { %v907_v56 = vpack.c.bf16 %v900_v53, %v900_v53  ;;  %v1266_v57 = vpop.f32.mrb[23].mxu0 }
 0x4f4   :  { %1268 = vmatpush3.bf16.xpose.msra.mxu1 %v907_v56 }
 0x4f7   :  { %v982_v59 = vpop.f32.mrb[24].mxu0 }
 0x4f8   :  { %v1277_v60 = vpop.f32.mrb[25].mxu0 }
 0x4f9   :  { %v985_v61 = vpop.f32.mrb[26].mxu0 }
 0x4fa   :  { %v1278_v62 = vpop.f32.mrb[27].mxu0 }
 0x4fb   :  { %1270 = vmatmul.mubr.bf16.vlgmr.msra.gmra.mrb[16].mxu1 %v906_v58 }
 0x5ce   :  { %v942_v4 = vpop.f32.mrb[16].mxu1 }
 0x5cf   :  { %v983_v5 = vadd.f32 %v982_v59, %v942_v4  ;;  %v1271_v6 = vpop.f32.mrb[17].mxu1 }
 0x5d0   :  { %v945_v7 = vpop.f32.mrb[18].mxu1 }
 0x5d1   :  { %v998_v8 = vadd.f32 %v997_v2, %v983_v5  ;;  %v1272_v9 = vpop.f32.mrb[19].mxu1 }
 0x5d3   :  { %1000 = vst.msk [vmem:[#allocation3] sm:$0x1] %vm999_vm8, %v998_v8 }
 0x5d4   :  { %1345 = shalt.err (!%p1342_p4)
}
 0x5d5   :  { %s1346_s8 = scalar_lea.hbm %s1738_s19, 16 }
 0x5d6   :  { %p1347_p5 = scmp.ne.s32.totalorder %s1738_s19, %s1346_s8  ;;  %p1350_p6 = scmp.lt.u32.totalorder %s1346_s8, %s1738_s19 }
 0x5d8   :  { %p1352_p7 = pnand %p1350_p6, %p1347_p5 }
 0x5da   :  { %1355 = shalt.err (!%p1352_p7)
}
 0x5db   :  { %1010 = dma.vmem_to_hbm [thread:$0]  %s1008_s16, 16, %s1738_s19, [#allocation4]  }
 0x5dc   :  { %1356 = dma.done.wait [#allocation4], 16  }
 0x5dd   :  { %1357 = vsyncadd [#allocation4], 4294967280 }
 0x5de   :  { %1014 = vsyncpa [#allocation4], 1 }

</bundles_post_ra>
